<compile_context>
chip_gen: v5e
topology: v5e:2x2
jax: 0.10.0
libtpu: 0.0.40
codegen_flags: <defaults>
</compile_context>

<pallas_src>
import functools

import jax
import jax.numpy as jnp
from jax.experimental import pallas as pl
from jax.experimental.pallas import tpu as pltpu


def _dma_copy_kernel(x_hbm_ref, o_hbm_ref, sem):
    # Single contiguous whole-array HBM->HBM copy; no VMEM staging, no grid.
    cp = pltpu.make_async_copy(x_hbm_ref, o_hbm_ref, sem)
    cp.start()
    cp.wait()


def _pallas_identity_copy(x):
    nbytes = x.size * x.dtype.itemsize
    return pl.pallas_call(
        _dma_copy_kernel,
        out_shape=jax.ShapeDtypeStruct(x.shape, x.dtype),
        in_specs=[pl.BlockSpec(memory_space=pl.ANY)],
        out_specs=pl.BlockSpec(memory_space=pl.ANY),
        scratch_shapes=[pltpu.SemaphoreType.DMA(())],
        cost_estimate=pl.CostEstimate(
            flops=0, transcendentals=0, bytes_accessed=2 * nbytes),
    )(x)


@functools.partial(jax.jit, static_argnames=("channel", "height", "width"))
def unflatten2d(x, *, channel, height, width):
    """Pallas equivalent of `input.view(input.size(0), channel, height, width)`."""
    batch = x.shape[0]
    # Contiguous reshape: metadata-only in XLA (free, moves no bytes).
    x4 = x.reshape(batch, channel, height, width)
    # TODO(synk): if no explicit op boundary were required, returning `x4`
    # directly (no pallas_call) makes this op completely free; the single
    # HBM->HBM DMA below is the cheapest way to keep a Pallas kernel in the
    # graph and is at least as fast as the old pipelined tiled copy.
    return _pallas_identity_copy(x4)


def _reference(x, channel, height, width):
    return x.reshape(x.shape[0], channel, height, width)


if __name__ == "__main__":
    key = jax.random.PRNGKey(0)

    B, C, H, W = 2, 4, 16, 16
    x = jax.random.normal(key, (B, C * H * W), dtype=jnp.float32)

    out = unflatten2d(x, channel=C, height=H, width=W)
    out = jax.block_until_ready(out)

    ref = _reference(x, C, H, W)
    assert out.shape == (B, C, H, W), out.shape
    assert jnp.array_equal(out, ref), float(jnp.max(jnp.abs(out - ref)))

    print("KERNEL_OK")
</pallas_src>

<mosaic_0001>
module attributes {stable_mosaic.version = 11 : i64} {
  func.func @_dma_copy_kernel(%arg0: memref<2x4x16x16xf32, #tpu.memory_space<any>>, %arg1: memref<2x4x16x16xf32, #tpu.memory_space<any>>, %arg2: memref<!tpu.dma_semaphore, #tpu.memory_space<semaphore_mem>>) attributes {dimension_semantics = [], scalar_prefetch = 0 : i64, scratch_operands = 1 : i64, tpu.core_type = #tpu.core_type<tc>} {
    tpu.enqueue_dma source(%arg0 : memref<2x4x16x16xf32, #tpu.memory_space<any>>) target(%arg1 : memref<2x4x16x16xf32, #tpu.memory_space<any>>) target_semaphore(%arg2 : memref<!tpu.dma_semaphore, #tpu.memory_space<semaphore_mem>>)
    tpu.wait_dma2 semaphore(%arg2 : memref<!tpu.dma_semaphore, #tpu.memory_space<semaphore_mem>>) src(%arg0 : memref<2x4x16x16xf32, #tpu.memory_space<any>>) dst(%arg1 : memref<2x4x16x16xf32, #tpu.memory_space<any>>)
    return
  }
}

</mosaic_0001>

<bundles_post_ra>
// kernel: unflatten2d.1
= control target key start
LH: loop header
LB: loop body
LE: loop exit
PB: predicated region body
PF: predicated region fallthrough
CT: control target
= control target key end

     0   :  { %s73_s0 = inlined_call_operand.vmem [shape: f32[2,4,16,16], index: 0, kind: input, shape index: {}]   ;;  %s74_s1 = inlined_call_operand.hbm [shape: f32[2,4,16,16], index: 1, kind: output, shape index: {}]  }
   0x1   :  { %s13_s8 = sshll.u32 %s73_s0, 4  ;;  %s15_s11 = sshll.u32 %s74_s1, 4  ;;  %s14_s8 = int_to_ptr.vmem [resolvable:$true] %s13_s8  ;;  %s16_s11 = int_to_ptr.hbm [resolvable:$true] %s15_s11 }
   0x2   :  { %18 = dma.vmem_to_hbm [thread:$0]  %s14_s8, 2048, %s16_s11, [#allocation2] }
   0x3   :  { %55 = dma.done.wait [#allocation2], 2048 }
   0x4   :  { %56 = vsyncadd [#allocation2], 4294965248 }
   0x5   :  { %24 = vsyncmov [#allocation2] }
   0x8   :  { %s25_s12 = vpop.sfrf %24 }
   0x9   :  { %p30_p0 = scmp.ne.s32.totalorder %s25_s12, 0 }
   0xb   :  { %29 = shalt.err (%p30_p0)  }

</bundles_post_ra>
